<compile_context>
chip_gen: v7x
topology: tpu7x:2x2x1
jax: 0.10.0
libtpu: 0.0.40
codegen_flags: <defaults>
</compile_context>

<pallas_src>
import functools

import jax
import jax.numpy as jnp
from jax import lax
from jax.experimental import pallas as pl
from jax.experimental.pallas import tpu as pltpu

BN_EPS = 1e-5


def _vmem_limit_bytes(footprint):
    # footprint + headroom for double-buffering / compiler temporaries,
    # clamped to a range valid on v5e / v6e / v7x scoped VMEM.
    return int(min(max(2 * footprint + (2 << 20), 8 << 20), 32 << 20))


# ---------------------------------------------------------------------------
# Single-tile fused kernel: whole batch resident in VMEM.
# ---------------------------------------------------------------------------
def _fused_kernel(x_ref, wt_ref, wot_ref, bias_ref, out_ref, *, real_n):
    x_lat = jnp.dot(x_ref[...], wt_ref[...], preferred_element_type=jnp.float32)
    x_lat = jnp.maximum(x_lat, 0.0)                          # ReLU
    inv_n = jnp.float32(1.0 / real_n)
    mean = jnp.sum(x_lat, axis=0, keepdims=True) * inv_n     # (1, L)
    cent = x_lat - mean
    var = jnp.sum(cent * cent, axis=0, keepdims=True) * inv_n  # exact two-pass
    x_hat = cent * lax.rsqrt(var + BN_EPS)
    out = jnp.dot(x_hat.astype(wot_ref.dtype), wot_ref[...],
                  preferred_element_type=jnp.float32)
    out_ref[...] = (out + bias_ref[...]).astype(out_ref.dtype)


# ---------------------------------------------------------------------------
# Two-pass batch-tiled kernels for batches that do not fit a single tile.
# ---------------------------------------------------------------------------
def _stats_kernel(x_ref, wt_ref, sum_ref, sumsq_ref, *, tile_n, real_n, ragged):
    i = pl.program_id(0)

    @pl.when(i == 0)
    def _():
        sum_ref[...] = jnp.zeros_like(sum_ref)
        sumsq_ref[...] = jnp.zeros_like(sumsq_ref)

    x_lat = jnp.dot(x_ref[...], wt_ref[...], preferred_element_type=jnp.float32)
    x_lat = jnp.maximum(x_lat, 0.0)
    if ragged:
        # Zero out-of-range rows of the last (partial) tile so the column
        # sums are exact over the real batch.
        row = lax.broadcasted_iota(jnp.int32, x_lat.shape, 0) + i * tile_n
        x_lat = jnp.where(row < real_n, x_lat, 0.0)
    # TODO(synk): switch to a Welford-style update if activation magnitudes
    # ever make the E[x^2] - mean^2 form cancellation-prone.
    sum_ref[...] += jnp.sum(x_lat, axis=0, keepdims=True)
    sumsq_ref[...] += jnp.sum(x_lat * x_lat, axis=0, keepdims=True)


def _decode_kernel(x_ref, wt_ref, wot_ref, bias_ref, sum_ref, sumsq_ref,
                   out_ref, *, real_n):
    inv_n = jnp.float32(1.0 / real_n)
    mean = sum_ref[...] * inv_n                                    # (1, L)
    var = jnp.maximum(sumsq_ref[...] * inv_n - mean * mean, 0.0)   # biased var
    rstd = lax.rsqrt(var + BN_EPS)

    # Re-run the cheap encoder matmul for this tile (cheaper than an HBM
    # round-trip for x_lat at these F/L sizes).
    x_lat = jnp.dot(x_ref[...], wt_ref[...], preferred_element_type=jnp.float32)
    x_lat = jnp.maximum(x_lat, 0.0)
    x_hat = (x_lat - mean) * rstd
    out = jnp.dot(x_hat.astype(wot_ref.dtype), wot_ref[...],
                  preferred_element_type=jnp.float32)
    # TODO(synk): if store-slot bound at very large N, pack 4 output rows per
    # 128-lane vreg in the wrapper instead of these 32-lane-wide stores.
    out_ref[...] = (out + bias_ref[...]).astype(out_ref.dtype)


def dense_naive_ae(x, weight, weight_o, gamma=None, beta=None, *, tile_n=1024):
    n, f = x.shape
    l, f2 = weight.shape
    assert f2 == f and weight_o.shape == (f, l)
    if gamma is None:
        gamma = jnp.ones((l,), weight_o.dtype)
    if beta is None:
        beta = jnp.zeros((l,), weight_o.dtype)

    # Fold the BN affine into the decoder projection (tiny one-time XLA ops):
    #   bnorm(z) @ weight_o.T == zhat @ (weight_o * gamma).T + weight_o @ beta
    w_t = weight.T                                            # (F, L)
    wo_eff_t = (weight_o * gamma[None, :]).T                  # (L, F)
    bias_out = (weight_o.astype(jnp.float32)
                @ beta.astype(jnp.float32)).reshape(1, f)     # (1, F), f32

    out_shape = jax.ShapeDtypeStruct((n, f), x.dtype)
    itemsize = x.dtype.itemsize
    w_bytes = (w_t.size * w_t.dtype.itemsize
               + wo_eff_t.size * wo_eff_t.dtype.itemsize
               + bias_out.size * 4)

    if n <= max(tile_n, 8):
        # ---- single fused kernel: whole batch resident in VMEM ----
        footprint = (2 * n * f * itemsize      # x + out
                     + 2 * n * l * 4           # x_lat / x_hat (f32)
                     + w_bytes)
        vmem_spec = pl.BlockSpec(memory_space=pltpu.MemorySpace.VMEM)
        return pl.pallas_call(
            functools.partial(_fused_kernel, real_n=float(n)),
            out_shape=out_shape,
            in_specs=[vmem_spec] * 4,
            out_specs=vmem_spec,
            compiler_params=pltpu.CompilerParams(
                vmem_limit_bytes=_vmem_limit_bytes(footprint)),
            cost_estimate=pl.CostEstimate(
                flops=4 * n * f * l,
                transcendentals=l,
                bytes_accessed=2 * n * f * itemsize + w_bytes),
        )(x, w_t, wo_eff_t, bias_out)

    # ---- two-pass batch-tiled path ----
    tile_n = max(8, tile_n - tile_n % 8)            # sublane-aligned batch tile
    n_tiles = pl.cdiv(n, tile_n)
    ragged = (n % tile_n) != 0

    footprint = (4 * tile_n * f * itemsize          # double-buffered in + out
                 + 2 * tile_n * l * 4               # x_lat / x_hat (f32)
                 + w_bytes + 4 * l * 4)
    vlim = _vmem_limit_bytes(footprint)
    cparams_arb = pltpu.CompilerParams(dimension_semantics=("arbitrary",),
                                       vmem_limit_bytes=vlim)
    cparams_par = pltpu.CompilerParams(dimension_semantics=("parallel",),
                                       vmem_limit_bytes=vlim)

    x_spec = pl.BlockSpec((tile_n, f), lambda i: (i, 0))
    wt_spec = pl.BlockSpec((f, l), lambda i: (0, 0))
    wot_spec = pl.BlockSpec((l, f), lambda i: (0, 0))
    bias_spec = pl.BlockSpec((1, f), lambda i: (0, 0))
    stat_spec = pl.BlockSpec((1, l), lambda i: (0, 0))

    # Pass 1: global BatchNorm statistics (column sum / sum-of-squares).
    sums, sumsqs = pl.pallas_call(
        functools.partial(_stats_kernel, tile_n=tile_n, real_n=n, ragged=ragged),
        out_shape=(jax.ShapeDtypeStruct((1, l), jnp.float32),
                   jax.ShapeDtypeStruct((1, l), jnp.float32)),
        grid=(n_tiles,),
        in_specs=[x_spec, wt_spec],
        out_specs=(stat_spec, stat_spec),
        compiler_params=cparams_arb,
        cost_estimate=pl.CostEstimate(
            flops=2 * n * f * l,
            transcendentals=0,
            bytes_accessed=n * f * itemsize + w_bytes),
    )(x, w_t)

    # Pass 2: normalize with global stats + decoder matmul (batch-parallel).
    return pl.pallas_call(
        functools.partial(_decode_kernel, real_n=float(n)),
        out_shape=out_shape,
        grid=(n_tiles,),
        in_specs=[x_spec, wt_spec, wot_spec, bias_spec, stat_spec, stat_spec],
        out_specs=pl.BlockSpec((tile_n, f), lambda i: (i, 0)),
        compiler_params=cparams_par,
        cost_estimate=pl.CostEstimate(
            flops=4 * n * f * l,
            transcendentals=l,
            bytes_accessed=2 * n * f * itemsize + w_bytes),
    )(x, w_t, wo_eff_t, bias_out, sums, sumsqs)


def dense_naive_ae_ref(x, weight, weight_o, gamma, beta):
    x_lat = jnp.maximum(x @ weight.T, 0.0)
    mean = jnp.mean(x_lat, axis=0, keepdims=True)
    var = jnp.mean((x_lat - mean) ** 2, axis=0, keepdims=True)
    x_hat = (x_lat - mean) / jnp.sqrt(var + BN_EPS)
    x_hat = x_hat * gamma[None, :] + beta[None, :]
    return x_hat @ weight_o.T


if __name__ == "__main__":
    feature_dim, latent_dim = 32, 16
    key = jax.random.PRNGKey(0)
    kx, kw, kwo, kx2 = jax.random.split(key, 4)

    # torch.rand -> uniform[0, 1); BatchNorm1d default affine gamma=1, beta=0.
    weight = jax.random.uniform(kw, (latent_dim, feature_dim), dtype=jnp.float32)
    weight_o = jax.random.uniform(kwo, (feature_dim, latent_dim), dtype=jnp.float32)
    gamma = jnp.ones((latent_dim,), dtype=jnp.float32)
    beta = jnp.zeros((latent_dim,), dtype=jnp.float32)

    # Small batch -> single fused VMEM-resident kernel.
    x_small = jax.random.uniform(kx, (8, feature_dim), dtype=jnp.float32)
    out_small = jax.block_until_ready(
        dense_naive_ae(x_small, weight, weight_o, gamma, beta))
    ref_small = dense_naive_ae_ref(x_small, weight, weight_o, gamma, beta)
    assert out_small.shape == (8, feature_dim) and out_small.dtype == x_small.dtype
    assert jnp.allclose(out_small, ref_small, atol=1e-4, rtol=1e-4)

    # Larger ragged batch -> two-pass batch-tiled grid path (5 tiles, partial last).
    x_big = jax.random.uniform(kx2, (300, feature_dim), dtype=jnp.float32)
    out_big = jax.block_until_ready(
        dense_naive_ae(x_big, weight, weight_o, gamma, beta, tile_n=64))
    ref_big = dense_naive_ae_ref(x_big, weight, weight_o, gamma, beta)
    assert out_big.shape == (300, feature_dim) and out_big.dtype == x_big.dtype
    assert jnp.allclose(out_big, ref_big, atol=1e-2, rtol=1e-3)

    print("KERNEL_OK")
</pallas_src>

<mosaic_0001>
module attributes {stable_mosaic.version = 11 : i64} {
  func.func @_fused_kernel(%arg0: memref<8x32xf32, #tpu.memory_space<vmem>>, %arg1: memref<32x16xf32, #tpu.memory_space<vmem>>, %arg2: memref<16x32xf32, #tpu.memory_space<vmem>>, %arg3: memref<1x32xf32, #tpu.memory_space<vmem>>, %arg4: memref<8x32xf32, #tpu.memory_space<vmem>>) attributes {dimension_semantics = [], scalar_prefetch = 0 : i64, scratch_operands = 0 : i64, tpu.core_type = #tpu.core_type<tc>} {
    %c0 = arith.constant 0 : index
    %c0_0 = arith.constant 0 : index
    %0 = vector.load %arg0[%c0, %c0_0] : memref<8x32xf32, #tpu.memory_space<vmem>>, vector<8x32xf32>
    %c0_1 = arith.constant 0 : index
    %c0_2 = arith.constant 0 : index
    %1 = vector.load %arg1[%c0_1, %c0_2] : memref<32x16xf32, #tpu.memory_space<vmem>>, vector<32x16xf32>
    %cst = arith.constant dense<0.000000e+00> : vector<8x16xf32>
    %2 = tpu.matmul %0, %1, %cst {dimension_numbers = #tpu.dot_dimension_numbers<[1], [0], [0], [1], [0, 0, 1, 1], [], []>} : vector<8x32xf32>, vector<32x16xf32>, vector<8x16xf32> -> vector<8x16xf32>
    %cst_3 = arith.constant 0.000000e+00 : f32
    %3 = vector.broadcast %cst_3 : f32 to vector<8x16xf32>
    %4 = arith.maximumf %2, %3 : vector<8x16xf32>
    %cst_4 = arith.constant dense<0.000000e+00> : vector<16xf32>
    %5 = vector.multi_reduction <add>, %4, %cst_4 [0] : vector<8x16xf32> to vector<16xf32>
    %6 = vector.shape_cast %5 : vector<16xf32> to vector<1x16xf32>
    %cst_5 = arith.constant 1.250000e-01 : f32
    %7 = vector.broadcast %cst_5 : f32 to vector<1x16xf32>
    %8 = arith.mulf %6, %7 : vector<1x16xf32>
    %9 = vector.broadcast %8 : vector<1x16xf32> to vector<8x16xf32>
    %10 = arith.subf %4, %9 : vector<8x16xf32>
    %11 = arith.mulf %10, %10 : vector<8x16xf32>
    %cst_6 = arith.constant dense<0.000000e+00> : vector<16xf32>
    %12 = vector.multi_reduction <add>, %11, %cst_6 [0] : vector<8x16xf32> to vector<16xf32>
    %13 = vector.shape_cast %12 : vector<16xf32> to vector<1x16xf32>
    %cst_7 = arith.constant 1.250000e-01 : f32
    %14 = vector.broadcast %cst_7 : f32 to vector<1x16xf32>
    %15 = arith.mulf %13, %14 : vector<1x16xf32>
    %cst_8 = arith.constant 9.99999974E-6 : f32
    %16 = vector.broadcast %cst_8 : f32 to vector<1x16xf32>
    %17 = arith.addf %15, %16 : vector<1x16xf32>
    %18 = math.rsqrt %17 : vector<1x16xf32>
    %19 = vector.broadcast %18 : vector<1x16xf32> to vector<8x16xf32>
    %20 = arith.mulf %10, %19 : vector<8x16xf32>
    %c0_9 = arith.constant 0 : index
    %c0_10 = arith.constant 0 : index
    %21 = vector.load %arg2[%c0_9, %c0_10] : memref<16x32xf32, #tpu.memory_space<vmem>>, vector<16x32xf32>
    %cst_11 = arith.constant dense<0.000000e+00> : vector<8x32xf32>
    %22 = tpu.matmul %20, %21, %cst_11 {dimension_numbers = #tpu.dot_dimension_numbers<[1], [0], [0], [1], [0, 0, 1, 1], [], []>} : vector<8x16xf32>, vector<16x32xf32>, vector<8x32xf32> -> vector<8x32xf32>
    %c0_12 = arith.constant 0 : index
    %c0_13 = arith.constant 0 : index
    %23 = vector.load %arg3[%c0_12, %c0_13] : memref<1x32xf32, #tpu.memory_space<vmem>>, vector<1x32xf32>
    %24 = vector.broadcast %23 : vector<1x32xf32> to vector<8x32xf32>
    %25 = arith.addf %22, %24 : vector<8x32xf32>
    %c0_14 = arith.constant 0 : index
    %c0_15 = arith.constant 0 : index
    %26 = vector.load %arg4[%c0_14, %c0_15] : memref<8x32xf32, #tpu.memory_space<vmem>>, vector<8x32xf32>
    tpu.vector_store %arg4[%c0_14, %c0_15], %25 {strides = array<i32>} : memref<8x32xf32, #tpu.memory_space<vmem>>, vector<8x32xf32>,
    return
  }
}

</mosaic_0001>

<bundles_post_ra>
// kernel: tpu_custom_call.1
= control target key start
LH: loop header
LB: loop body
LE: loop exit
PB: predicated region body
PF: predicated region fallthrough
CT: control target
= control target key end

     0   :  { %v285_v3 = vmov 0.0|0.0   ;;  %vm286_vm0 = vmmov 0   ;;  %v287_v6 = vmov 0.0   ;;  %s355_s0 = inlined_call_operand.vmem [shape: f32[8,32], index: 0, kind: input, shape index: {}]   ;;  %s356_s1 = inlined_call_operand.vmem [shape: f32[32,16], index: 1, kind: input, shape index: {}]   ;;  %s357_s2 = inlined_call_operand.vmem [shape: f32[16,32], index: 2, kind: input, shape index: {}]   ;;  %s358_s3 = inlined_call_operand.vmem [shape: f32[1,32], index: 3, kind: input, shape index: {}]   ;;  %s359_s4 = inlined_call_operand.hbm [shape: f32[8,32], index: 4, kind: output, shape index: {}]  }
   0x1   :  { %v19_v0 = vld [vmem:[%s356_s1] sm:$0xff]  ;;  %v20_v1 = vld [vmem:[%s356_s1 + $0x8] sm:$0xff]  ;;  %v21_v2 = vld [vmem:[%s356_s1 + $0x10] sm:$0xff]  ;;  %246 = vmatprep.subr.bf16.mxu0 %v285_v3  ;;  %236 = vmatprep.mubr.msk.f32.mxu0 %vm286_vm0, %v287_v6 }
   0x2   :  { %v247_v4 = vpack.c.bf16 %v20_v1, %v19_v0  ;;  %v22_v5 = vld [vmem:[%s356_s1 + $0x18] sm:$0xff] }
   0x3   :  { %9 = vsyncpa [#allocation3], 0  ;;  %252 = vmatprep.subr.bf16.mxu1 %v285_v3  ;;  %243 = vmatprep.mubr.msk.f32.mxu1 %vm286_vm0, %v287_v6  ;;  %v250_v7 = vpack.c.bf16 %v22_v5, %v21_v2  ;;  %v18_v8 = vld [vmem:[%s355_s0] sm:$0xff]  ;;  %vm23_vm1 = vcmask 261120   ;;  %v121_v10 = vld [vmem:[%s357_s2 + $0x8] sm:$0xff]  ;;  %vm98_vm2 = vcmask 130048  }
   0x4   :  { %248 = vmatpush3.bf16.msra.mxu0 %v247_v4  ;;  %v120_v9 = vld [vmem:[%s357_s2] sm:$0xff]  ;;  %s288_s28 = smov [#allocation2]  }
   0x5   :  { %249 = vmatprep.subr.bf16.mxu0 %v285_v3  ;;  %v253_v11 = vpack.c.bf16 %v121_v10, %v120_v9  ;;  %v218_v36 = vld [vmem:[%s358_s3] ss:$0 sm:$0xff]  ;;  %s209_s29 = sshll.u32 %s288_s28, 4  ;;  %s210_s29 = int_to_ptr.vmem [resolvable:$true] %s209_s29 }
   0x6   :  { %s261_s30 = scalar_lea.vmem %s210_s29, 128  ;;  %p266_p1 = scmp.lt.s32.totalorder %s210_s29, %s210_s29 }
   0x7   :  { %254 = vmatpush3.bf16.msra.mxu1 %v253_v11  ;;  %p262_p0 = scmp.ne.s32.totalorder %s210_s29, %s261_s30  ;;  %p267_p2 = scmp.lt.s32.totalorder %s261_s30, %s261_s30 }
   0x8   :  { %251 = vmatpush3.bf16.msra.mxu0 %v250_v7 }
   0x9   :  { %p268_p3 = por %p267_p2, %p266_p1 }
   0xb   :  { %237 = vmatmul.mubr.msk.f32.vlgmr.msra.gmra.mrb[0].mxu0 %vm23_vm1, %v18_v8  ;;  %p269_p4 = pnand %p268_p3, %p262_p0 }
  0xde   :  { %v93_v12 = vpop.f32.mrb[0].mxu0 }
  0xdf   :  { %v97_v13 = vmax.f32 %v93_v12, 0.0  ;;  %v238_v14 = vpop.f32.mrb[1].mxu0 }
  0xe1   :  { %v99_v15 = vsel %vm98_vm2, %v97_v13, 0.0 }
  0xe2   :  { %v100_v16 = vrot.slane %v99_v15, 4 }
  0xe4   :  { %v101_v17 = vadd.f32 %v100_v16, %v99_v15 }
  0xe6   :  { %v102_v18 = vrot.slane %v101_v17, 2 }
  0xe8   :  { %v103_v19 = vadd.f32 %v102_v18, %v101_v17 }
  0xea   :  { %v104_v20 = vrot.slane %v103_v19, 1 }
  0xec   :  { %v105_v21 = vadd.f32 %v104_v20, %v103_v19 }
  0xee   :  { %v106_v22 = vmul.f32 0.125, %v105_v21 }
  0xf0   :  { %v107_v23 = vsub.f32 %v97_v13, %v106_v22 }
  0xf2   :  { %v108_v24 = vmul.f32 %v107_v23, %v107_v23 }
  0xf4   :  { %v109_v25 = vsel %vm98_vm2, %v108_v24, 0.0 }
  0xf5   :  { %v110_v26 = vrot.slane %v109_v25, 4 }
  0xf7   :  { %v111_v27 = vadd.f32 %v110_v26, %v109_v25 }
  0xf9   :  { %v112_v28 = vrot.slane %v111_v27, 2 }
  0xfb   :  { %v113_v29 = vadd.f32 %v112_v28, %v111_v27 }
  0xfd   :  { %v114_v30 = vrot.slane %v113_v29, 1 }
  0xff   :  { %v115_v31 = vadd.f32 %v114_v30, %v113_v29 }
 0x101   :  { %v116_v32 = vmul.f32 0.125, %v115_v31 }
 0x103   :  { %v117_v33 = vadd.f32 1e-05, %v116_v32 }
 0x105   :  { %259 = vrsqrt.f32 %v117_v33 }
 0x10f   :  { %v260_v34 = vpop.eup %259 }
 0x110   :  { %v119_v35 = vmul.f32 %v260_v34, %v107_v23 }
 0x112   :  { %244 = vmatmul.mubr.msk.f32.vlgmr.msra.gmra.mrb[0].mxu1 %vm98_vm2, %v119_v35 }
 0x1e5   :  { %v198_v37 = vpop.f32.mrb[0].mxu1 }
 0x1e6   :  { %v199_v38 = vadd.f32 %v218_v36, %v198_v37  ;;  %v245_v39 = vpop.f32.mrb[1].mxu1 }
 0x1e8   :  { %202 = vst.msk [vmem:[#allocation2] sm:$0xff] %vm23_vm1, %v199_v38 }
 0x1e9   :  { %272 = shalt.err (!%p269_p4)
}
 0x1ea   :  { %s273_s7 = scalar_lea.hbm %s359_s4, 128 }
 0x1eb   :  { %p274_p5 = scmp.ne.s32.totalorder %s359_s4, %s273_s7  ;;  %p277_p6 = scmp.lt.u32.totalorder %s273_s7, %s359_s4 }
 0x1ed   :  { %p279_p7 = pnand %p277_p6, %p274_p5 }
 0x1ef   :  { %282 = shalt.err (!%p279_p7)
}
 0x1f0   :  { %212 = dma.vmem_to_hbm [thread:$0]  %s210_s29, 128, %s359_s4, [#allocation3]  }
 0x1f1   :  { %283 = dma.done.wait [#allocation3], 128  }
 0x1f2   :  { %284 = vsyncadd [#allocation3], 4294967168 }
 0x1f3   :  { %216 = vsyncpa [#allocation3], 1 }

</bundles_post_ra>
